<compile_context>
chip_gen: v5e
topology: v5e:2x2
jax: 0.10.0
libtpu: 0.0.40
codegen_flags: <defaults>
</compile_context>

<pallas_src>
import functools

import jax
import jax.numpy as jnp
from jax.experimental import pallas as pl
from jax.experimental.pallas import tpu as pltpu

_LANE = 128       # lane width (last dim)
_SUBLANE = 8      # f32 sublane tiling (second-to-last dim)
_MAX_TM = 256     # batch tile cap: fills the v6e/v7x 256-wide MXU, VMEM-safe on v7x
_NEG_BIG = -1e30  # masks padded logit lanes out of the softmax normalizer


def _round_up(v, m):
    return (v + m - 1) // m * m


def _make_mlp_kernel(without_rel):
    """Build a fused MLP kernel for a fixed (static) layer structure."""
    n_layers = len(without_rel)

    def kernel(*refs):
        # refs = (x_ref, w0, b0, w1, b1, ..., o_ref)
        x_ref = refs[0]
        o_ref = refs[-1]
        params = refs[1:-1]
        assert len(params) == 2 * n_layers

        h = x_ref[...]                        # (TM, in_pad) f32
        for j in range(n_layers):             # static unroll over layers
            w = params[2 * j][...]            # (in_pad_j, out_pad_j) bf16
            b = params[2 * j + 1][...]        # (1, out_pad_j) f32
            # bf16 x bf16 on the MXU, f32 accumulation.
            h = jnp.dot(h.astype(w.dtype), w,
                        preferred_element_type=jnp.float32) + b
            if not without_rel[j]:
                h = jnp.maximum(h, 0.0)       # ReLU in f32 on the VPU

        # log_softmax along dim=1 (features), numerically stable.
        # Padded lanes of the final logits carry ~-1e30 (from the padded bias),
        # so exp() of them is exactly 0 and the normalizer is unaffected.
        m = jnp.max(h, axis=-1, keepdims=True)
        s = h - m
        lse = jnp.log(jnp.sum(jnp.exp(s), axis=-1, keepdims=True))
        o_ref[...] = (s - lse).astype(o_ref.dtype)

    return kernel


@functools.partial(jax.jit, static_argnames=("without_rel",))
def network_model_forward(x, weights, biases, *, without_rel):
    """Forward pass of NetworkModel.

    Args:
      x: input of shape (B, ...); flattened to (B, prod(rest)) = (B, dims[0]).
      weights: tuple of (in_j, out_j) f32 matrices (already transposed vs. PyTorch).
      biases:  tuple of (out_j,) or (1, out_j) f32 vectors.
      without_rel: static tuple of bools, one per layer.
    Returns:
      (B, dims[-1]) float32 log-probabilities.
    """
    batch = x.shape[0]
    x_flat = x.reshape(batch, -1).astype(jnp.float32)
    in_dim = x_flat.shape[1]
    n_layers = len(weights)
    out_dim = weights[-1].shape[1]

    # ---- lane-dense padding of every feature dim (multiples of 128) ----
    in_pad0 = _round_up(in_dim, _LANE)
    out_pads = [_round_up(w.shape[1], _LANE) for w in weights]
    in_pads = [in_pad0] + out_pads[:-1]

    x_p = jnp.pad(x_flat, ((0, 0), (0, in_pad0 - in_dim)))

    w_p, b_p = [], []
    for j, (w, bia) in enumerate(zip(weights, biases)):
        fi, fo = w.shape
        wp = jnp.pad(w.astype(jnp.float32),
                     ((0, in_pads[j] - fi), (0, out_pads[j] - fo)))
        w_p.append(wp.astype(jnp.bfloat16))          # bf16 MXU operands
        # Final layer: padded logit lanes get a huge negative bias so they drop
        # out of the log-softmax.  Intermediate layers: zero (ReLU(0)=0, and the
        # next layer's padded weight rows are zero, so no contamination).
        pad_fill = _NEG_BIG if j == n_layers - 1 else 0.0
        bp = jnp.pad(bia.reshape(1, fo).astype(jnp.float32),
                     ((0, 0), (0, out_pads[j] - fo)),
                     constant_values=pad_fill)
        b_p.append(bp)

    # ---- batch tiling ----
    tm = min(_MAX_TM, _round_up(batch, _SUBLANE))
    b_pad = _round_up(batch, tm)
    x_p = jnp.pad(x_p, ((0, b_pad - batch), (0, 0)))
    grid = (b_pad // tm,)

    kernel = _make_mlp_kernel(without_rel)

    # BlockSpecs: activations/output tiled on batch; weights/biases resident
    # (constant block index -> fetched once, kept in VMEM across grid steps).
    in_specs = [pl.BlockSpec((tm, in_pad0), lambda i: (i, 0))]
    args = [x_p]
    for j in range(n_layers):
        in_specs.append(pl.BlockSpec((in_pads[j], out_pads[j]), lambda i: (0, 0)))
        in_specs.append(pl.BlockSpec((1, out_pads[j]), lambda i: (0, 0)))
        args.append(w_p[j])
        args.append(b_p[j])
    out_spec = pl.BlockSpec((tm, out_pads[-1]), lambda i: (i, 0))

    flops = 2 * b_pad * sum(ip * op for ip, op in zip(in_pads, out_pads))
    bytes_accessed = (x_p.size * 4
                      + sum(w.size * 2 for w in w_p)
                      + sum(b.size * 4 for b in b_p)
                      + b_pad * out_pads[-1] * 4)
    cost = pl.CostEstimate(flops=flops,
                           transcendentals=b_pad * out_pads[-1],
                           bytes_accessed=bytes_accessed)

    out_padded = pl.pallas_call(
        kernel,
        out_shape=jax.ShapeDtypeStruct((b_pad, out_pads[-1]), jnp.float32),
        grid=grid,
        in_specs=in_specs,
        out_specs=out_spec,
        compiler_params=pltpu.CompilerParams(
            dimension_semantics=("parallel",)),   # v7x: shard batch across 2 TCs
        cost_estimate=cost,
    )(*args)

    # Strip batch and lane padding.
    return out_padded[:batch, :out_dim]


def _reference_forward(x, weights, biases, without_rel):
    """Pure-JAX reference mirroring the kernel's bf16-matmul / f32-accumulate math."""
    h = x.reshape(x.shape[0], -1).astype(jnp.float32)
    for j, (w, b) in enumerate(zip(weights, biases)):
        h = jnp.dot(h.astype(jnp.bfloat16), w.astype(jnp.bfloat16),
                    preferred_element_type=jnp.float32) + b.reshape(1, -1)
        if not without_rel[j]:
            h = jnp.maximum(h, 0.0)
    return jax.nn.log_softmax(h, axis=1)


if __name__ == "__main__":
    # Module config (synthetic, deterministic).
    dims = (256, 128, 64, 10)           # dims[0] must equal flattened input size
    without_rel = (False, False, True)  # ReLU after layers 0 and 1, not after last
    # alpha / beta / goodness_of_fit_cutoff affect pruning only, not the forward pass.

    key = jax.random.PRNGKey(0)
    kx, *kps = jax.random.split(key, 1 + 2 * (len(dims) - 1))

    # Input: NCHW-like (2, 1, 16, 16) -> flatten(start_dim=1) -> (2, 256)
    x = jax.random.normal(kx, (2, 1, 16, 16), dtype=jnp.float32)

    weights = []
    biases = []
    for i in range(1, len(dims)):
        fan_in, fan_out = dims[i - 1], dims[i]
        kw, kb = kps[2 * (i - 1)], kps[2 * (i - 1) + 1]
        # PyTorch Linear weight is (out, in); store transposed as (in, out).
        w = (jax.random.normal(kw, (fan_in, fan_out), dtype=jnp.float32)
             * (1.0 / jnp.sqrt(fan_in)))
        bvec = jax.random.normal(kb, (1, fan_out), dtype=jnp.float32) * 0.01
        weights.append(w)
        biases.append(bvec)

    out = network_model_forward(
        x, tuple(weights), tuple(biases), without_rel=without_rel)
    out = jax.block_until_ready(out)

    ref = _reference_forward(x, weights, biases, without_rel)
    assert out.shape == (2, dims[-1])
    assert jnp.max(jnp.abs(out - ref)) < 1e-3, "mismatch vs. pure-JAX reference"

    print("KERNEL_OK")
</pallas_src>

<mosaic_0001>
module attributes {stable_mosaic.version = 11 : i64} {
  func.func @kernel(%arg0: i32, %arg1: memref<8x256xf32, #tpu.memory_space<vmem>>, %arg2: memref<256x128xbf16, #tpu.memory_space<vmem>>, %arg3: memref<1x128xf32, #tpu.memory_space<vmem>>, %arg4: memref<128x128xbf16, #tpu.memory_space<vmem>>, %arg5: memref<1x128xf32, #tpu.memory_space<vmem>>, %arg6: memref<128x128xbf16, #tpu.memory_space<vmem>>, %arg7: memref<1x128xf32, #tpu.memory_space<vmem>>, %arg8: memref<8x128xf32, #tpu.memory_space<vmem>>) attributes {dimension_semantics = [#tpu.dimension_semantics<parallel>], iteration_bounds = array<i64: 1>, scalar_prefetch = 0 : i64, scratch_operands = 0 : i64, tpu.core_type = #tpu.core_type<tc>, window_params = [{transform_indices = @transform_0, window_bounds = array<i64: 8, 256>}, {pipeline_mode = #tpu.pipeline_mode<synchronous>, transform_indices = @transform_1, window_bounds = array<i64: 256, 128>}, {pipeline_mode = #tpu.pipeline_mode<synchronous>, transform_indices = @transform_2, window_bounds = array<i64: 1, 128>}, {pipeline_mode = #tpu.pipeline_mode<synchronous>, transform_indices = @transform_3, window_bounds = array<i64: 128, 128>}, {pipeline_mode = #tpu.pipeline_mode<synchronous>, transform_indices = @transform_4, window_bounds = array<i64: 1, 128>}, {pipeline_mode = #tpu.pipeline_mode<synchronous>, transform_indices = @transform_5, window_bounds = array<i64: 128, 128>}, {pipeline_mode = #tpu.pipeline_mode<synchronous>, transform_indices = @transform_6, window_bounds = array<i64: 1, 128>}, {transform_indices = @transform_7, window_bounds = array<i64: 8, 128>}]} {
    %c0 = arith.constant 0 : index
    %c0_0 = arith.constant 0 : index
    %0 = vector.load %arg1[%c0, %c0_0] : memref<8x256xf32, #tpu.memory_space<vmem>>, vector<8x256xf32>
    %c0_1 = arith.constant 0 : index
    %c0_2 = arith.constant 0 : index
    %1 = vector.load %arg2[%c0_1, %c0_2] : memref<256x128xbf16, #tpu.memory_space<vmem>>, vector<256x128xbf16>
    %c0_3 = arith.constant 0 : index
    %c0_4 = arith.constant 0 : index
    %2 = vector.load %arg3[%c0_3, %c0_4] : memref<1x128xf32, #tpu.memory_space<vmem>>, vector<1x128xf32>
    %3 = arith.truncf %0 : vector<8x256xf32> to vector<8x256xbf16>
    %cst = arith.constant dense<0.000000e+00> : vector<8x128xf32>
    %4 = tpu.matmul %3, %1, %cst {dimension_numbers = #tpu.dot_dimension_numbers<[1], [0], [0], [1], [0, 0, 1, 1], [], []>} : vector<8x256xbf16>, vector<256x128xbf16>, vector<8x128xf32> -> vector<8x128xf32>
    %5 = vector.broadcast %2 : vector<1x128xf32> to vector<8x128xf32>
    %6 = arith.addf %4, %5 : vector<8x128xf32>
    %cst_5 = arith.constant 0.000000e+00 : f32
    %7 = vector.broadcast %cst_5 : f32 to vector<8x128xf32>
    %8 = arith.maximumf %6, %7 : vector<8x128xf32>
    %c0_6 = arith.constant 0 : index
    %c0_7 = arith.constant 0 : index
    %9 = vector.load %arg4[%c0_6, %c0_7] : memref<128x128xbf16, #tpu.memory_space<vmem>>, vector<128x128xbf16>
    %c0_8 = arith.constant 0 : index
    %c0_9 = arith.constant 0 : index
    %10 = vector.load %arg5[%c0_8, %c0_9] : memref<1x128xf32, #tpu.memory_space<vmem>>, vector<1x128xf32>
    %11 = arith.truncf %8 : vector<8x128xf32> to vector<8x128xbf16>
    %cst_10 = arith.constant dense<0.000000e+00> : vector<8x128xf32>
    %12 = tpu.matmul %11, %9, %cst_10 {dimension_numbers = #tpu.dot_dimension_numbers<[1], [0], [0], [1], [0, 0, 1, 1], [], []>} : vector<8x128xbf16>, vector<128x128xbf16>, vector<8x128xf32> -> vector<8x128xf32>
    %13 = vector.broadcast %10 : vector<1x128xf32> to vector<8x128xf32>
    %14 = arith.addf %12, %13 : vector<8x128xf32>
    %cst_11 = arith.constant 0.000000e+00 : f32
    %15 = vector.broadcast %cst_11 : f32 to vector<8x128xf32>
    %16 = arith.maximumf %14, %15 : vector<8x128xf32>
    %c0_12 = arith.constant 0 : index
    %c0_13 = arith.constant 0 : index
    %17 = vector.load %arg6[%c0_12, %c0_13] : memref<128x128xbf16, #tpu.memory_space<vmem>>, vector<128x128xbf16>
    %c0_14 = arith.constant 0 : index
    %c0_15 = arith.constant 0 : index
    %18 = vector.load %arg7[%c0_14, %c0_15] : memref<1x128xf32, #tpu.memory_space<vmem>>, vector<1x128xf32>
    %19 = arith.truncf %16 : vector<8x128xf32> to vector<8x128xbf16>
    %cst_16 = arith.constant dense<0.000000e+00> : vector<8x128xf32>
    %20 = tpu.matmul %19, %17, %cst_16 {dimension_numbers = #tpu.dot_dimension_numbers<[1], [0], [0], [1], [0, 0, 1, 1], [], []>} : vector<8x128xbf16>, vector<128x128xbf16>, vector<8x128xf32> -> vector<8x128xf32>
    %21 = vector.broadcast %18 : vector<1x128xf32> to vector<8x128xf32>
    %22 = arith.addf %20, %21 : vector<8x128xf32>
    %cst_17 = arith.constant dense<0xFF800000> : vector<8xf32>
    %23 = vector.multi_reduction <maximumf>, %22, %cst_17 [1] : vector<8x128xf32> to vector<8xf32>
    %24 = vector.shape_cast %23 : vector<8xf32> to vector<8x1xf32>
    %25 = vector.broadcast %24 : vector<8x1xf32> to vector<8x128xf32>
    %26 = arith.subf %22, %25 : vector<8x128xf32>
    %27 = math.exp %26 : vector<8x128xf32>
    %cst_18 = arith.constant dense<0.000000e+00> : vector<8xf32>
    %28 = vector.multi_reduction <add>, %27, %cst_18 [1] : vector<8x128xf32> to vector<8xf32>
    %29 = vector.shape_cast %28 : vector<8xf32> to vector<8x1xf32>
    %30 = math.log %29 : vector<8x1xf32>
    %31 = vector.broadcast %30 : vector<8x1xf32> to vector<8x128xf32>
    %32 = arith.subf %26, %31 : vector<8x128xf32>
    %c0_19 = arith.constant 0 : index
    %c0_20 = arith.constant 0 : index
    %33 = vector.load %arg8[%c0_19, %c0_20] : memref<8x128xf32, #tpu.memory_space<vmem>>, vector<8x128xf32>
    tpu.vector_store %arg8[%c0_19, %c0_20], %32 {strides = array<i32>} : memref<8x128xf32, #tpu.memory_space<vmem>>, vector<8x128xf32>,
    return
  }
  func.func @transform_0(%arg0: i32) -> (i32, i32) {
    %c0_i32 = arith.constant 0 : i32
    %c0_i32_0 = arith.constant 0 : i32
    return %arg0, %c0_i32 : i32, i32
  }
  func.func @transform_1(%arg0: i32) -> (i32, i32) {
    %c0_i32 = arith.constant 0 : i32
    %c0_i32_0 = arith.constant 0 : i32
    %c0_i32_1 = arith.constant 0 : i32
    return %c0_i32, %c0_i32_0 : i32, i32
  }
  func.func @transform_2(%arg0: i32) -> (i32, i32) {
    %c0_i32 = arith.constant 0 : i32
    %c0_i32_0 = arith.constant 0 : i32
    %c0_i32_1 = arith.constant 0 : i32
    return %c0_i32, %c0_i32_0 : i32, i32
  }
  func.func @transform_3(%arg0: i32) -> (i32, i32) {
    %c0_i32 = arith.constant 0 : i32
    %c0_i32_0 = arith.constant 0 : i32
    %c0_i32_1 = arith.constant 0 : i32
    return %c0_i32, %c0_i32_0 : i32, i32
  }
  func.func @transform_4(%arg0: i32) -> (i32, i32) {
    %c0_i32 = arith.constant 0 : i32
    %c0_i32_0 = arith.constant 0 : i32
    %c0_i32_1 = arith.constant 0 : i32
    return %c0_i32, %c0_i32_0 : i32, i32
  }
  func.func @transform_5(%arg0: i32) -> (i32, i32) {
    %c0_i32 = arith.constant 0 : i32
    %c0_i32_0 = arith.constant 0 : i32
    %c0_i32_1 = arith.constant 0 : i32
    return %c0_i32, %c0_i32_0 : i32, i32
  }
  func.func @transform_6(%arg0: i32) -> (i32, i32) {
    %c0_i32 = arith.constant 0 : i32
    %c0_i32_0 = arith.constant 0 : i32
    %c0_i32_1 = arith.constant 0 : i32
    return %c0_i32, %c0_i32_0 : i32, i32
  }
  func.func @transform_7(%arg0: i32) -> (i32, i32) {
    %c0_i32 = arith.constant 0 : i32
    %c0_i32_0 = arith.constant 0 : i32
    return %arg0, %c0_i32 : i32, i32
  }
}

</mosaic_0001>

<bundles_post_ra>
// kernel: network_model_forward.1
= control target key start
LH: loop header
LB: loop body
LE: loop exit
PB: predicated region body
PF: predicated region fallthrough
CT: control target
= control target key end

     0   :  { %s690_s1 = inlined_call_operand.vmem [shape: bf16[256,128], index: 1, kind: input, shape index: {}]   ;;  %s691_s3 = inlined_call_operand.vmem [shape: bf16[128,128], index: 3, kind: input, shape index: {}]   ;;  %s692_s2 = inlined_call_operand.vmem [shape: f32[1,128], index: 2, kind: input, shape index: {}]   ;;  %s693_s0 = inlined_call_operand.vmem [shape: f32[8,256], index: 0, kind: input, shape index: {}]   ;;  %s694_s4 = inlined_call_operand.vmem [shape: f32[1,128], index: 4, kind: input, shape index: {}]   ;;  %s695_s5 = inlined_call_operand.vmem [shape: bf16[128,128], index: 5, kind: input, shape index: {}]   ;;  %s696_s6 = inlined_call_operand.vmem [shape: f32[1,128], index: 6, kind: input, shape index: {}]   ;;  %s697_s7 = inlined_call_operand.vmem [shape: f32[8,128], index: 7, kind: output, shape index: {}]  }
   0x1   :  { %v504_v0 = vld [vmem:[%s690_s1 + $0x38] sm:$0xff]  ;;  %v503_v2 = vld [vmem:[%s690_s1 + $0x30] sm:$0xff]  ;;  %v502_v4 = vld [vmem:[%s690_s1 + $0x28] sm:$0xff] }
   0x2   :  { %v512_v1 = vld [vmem:[%s690_s1 + $0x78] sm:$0xff]  ;;  %162 = vmatpush.bf16.msra.mxu0 %v504_v0  ;;  %v511_v3 = vld [vmem:[%s690_s1 + $0x70] sm:$0xff]  ;;  %v510_v5 = vld [vmem:[%s690_s1 + $0x68] sm:$0xff] }
   0x3   :  { %175 = vmatpush.bf16.msra.mxu1 %v512_v1  ;;  %v520_v6 = vld [vmem:[%s691_s3 + $0x38] sm:$0xff]  ;;  %v519_v7 = vld [vmem:[%s691_s3 + $0x30] sm:$0xff]  ;;  %v501_v8 = vld [vmem:[%s690_s1 + $0x20] sm:$0xff] }
   0x4   :  { %258 = vmatpush.bf16.msra.mxu2 %v520_v6  ;;  %v509_v9 = vld [vmem:[%s690_s1 + $0x60] sm:$0xff]  ;;  %v518_v10 = vld [vmem:[%s691_s3 + $0x28] sm:$0xff]  ;;  %v500_v11 = vld [vmem:[%s690_s1 + $0x18] sm:$0xff] }
   0x5   :  { %v508_v12 = vld [vmem:[%s690_s1 + $0x58] sm:$0xff]  ;;  %v517_v13 = vld [vmem:[%s691_s3 + $0x20] sm:$0xff]  ;;  %v499_v14 = vld [vmem:[%s690_s1 + $0x10] sm:$0xff] }
   0x6   :  { %163 = vmatpush.bf16.msra.mxu0 %v503_v2  ;;  %v507_v15 = vld [vmem:[%s690_s1 + $0x50] sm:$0xff]  ;;  %v516_v16 = vld [vmem:[%s691_s3 + $0x18] sm:$0xff]  ;;  %v498_v17 = vld [vmem:[%s690_s1 + $0x8] sm:$0xff] }
   0x7   :  { %176 = vmatpush.bf16.msra.mxu1 %v511_v3  ;;  %v506_v18 = vld [vmem:[%s690_s1 + $0x48] sm:$0xff]  ;;  %v515_v19 = vld [vmem:[%s691_s3 + $0x10] sm:$0xff]  ;;  %v497_v20 = vld [vmem:[%s690_s1] sm:$0xff] }
   0x8   :  { %259 = vmatpush.bf16.msra.mxu2 %v519_v7  ;;  %v505_v21 = vld [vmem:[%s690_s1 + $0x40] sm:$0xff]  ;;  %v27_v23 = vld [vmem:[%s693_s0 + $0x8] sm:$0xff]  ;;  %v528_v28 = vld [vmem:[%s695_s5 + $0x38] sm:$0xff] }
   0x9   :  { %v26_v22 = vld [vmem:[%s693_s0] sm:$0xff]  ;;  %v62_v25 = vpack.c.bf16 %v27_v23, %v27_v23  ;;  %v514_v26 = vld [vmem:[%s691_s3 + $0x8] sm:$0xff]  ;;  %341 = vmatpush.bf16.msra.mxu3 %v528_v28  ;;  %v527_v29 = vld [vmem:[%s695_s5 + $0x30] sm:$0xff] }
   0xa   :  { %164 = vmatpush.bf16.msra.mxu0 %v502_v4  ;;  %v61_v24 = vpack.c.bf16 %v26_v22, %v26_v22  ;;  %v513_v27 = vld [vmem:[%s691_s3] sm:$0xff]  ;;  %v526_v30 = vld [vmem:[%s695_s5 + $0x28] sm:$0xff]  ;;  %v524_v32 = vld [vmem:[%s695_s5 + $0x18] sm:$0xff] }
   0xb   :  { %177 = vmatpush.bf16.msra.mxu1 %v510_v5  ;;  %v525_v31 = vld [vmem:[%s695_s5 + $0x20] sm:$0xff]  ;;  %v523_v33 = vld [vmem:[%s695_s5 + $0x10] sm:$0xff]  ;;  %v522_v43 = vld [vmem:[%s695_s5 + $0x8] sm:$0xff] }
   0xc   :  { %260 = vmatpush.bf16.msra.mxu2 %v518_v10  ;;  %v529_v34 = vld [vmem:[%s692_s2] ss:$0 sm:$0xff] }
   0xd   :  { %342 = vmatpush.bf16.msra.mxu3 %v527_v29  ;;  %v521_v44 = vld [vmem:[%s695_s5] sm:$0xff] }
   0xe   :  { %165 = vmatpush.bf16.msra.mxu0 %v501_v8  ;;  %v530_v45 = vld [vmem:[%s694_s4] ss:$0 sm:$0xff] }
   0xf   :  { %178 = vmatpush.bf16.msra.mxu1 %v509_v9  ;;  %v531_v51 = vld [vmem:[%s696_s6] ss:$0 sm:$0xff] }
  0x10   :  { %261 = vmatpush.bf16.msra.mxu2 %v517_v13 }
  0x11   :  { %343 = vmatpush.bf16.msra.mxu3 %v526_v30 }
  0x12   :  { %166 = vmatpush.bf16.msra.mxu0 %v500_v11 }
  0x13   :  { %179 = vmatpush.bf16.msra.mxu1 %v508_v12 }
  0x14   :  { %262 = vmatpush.bf16.msra.mxu2 %v516_v16 }
  0x15   :  { %344 = vmatpush.bf16.msra.mxu3 %v525_v31 }
  0x16   :  { %167 = vmatpush.bf16.msra.mxu0 %v499_v14 }
  0x17   :  { %180 = vmatpush.bf16.msra.mxu1 %v507_v15 }
  0x18   :  { %263 = vmatpush.bf16.msra.mxu2 %v515_v19 }
  0x19   :  { %345 = vmatpush.bf16.msra.mxu3 %v524_v32 }
  0x1a   :  { %168 = vmatpush.bf16.msra.mxu0 %v498_v17 }
  0x1b   :  { %181 = vmatpush.bf16.msra.mxu1 %v506_v18 }
  0x1c   :  { %264 = vmatpush.bf16.msra.mxu2 %v514_v26 }
  0x1d   :  { %346 = vmatpush.bf16.msra.mxu3 %v523_v33 }
  0x1e   :  { %169 = vmatpush.bf16.msra.mxu0 %v497_v20 }
  0x1f   :  { %182 = vmatpush.bf16.msra.mxu1 %v505_v21 }
  0x20   :  { %265 = vmatpush.bf16.msra.mxu2 %v513_v27 }
  0x21   :  { %170 = vmatmul.bf16.vlgmr.msra.gmra.mxu0 %v61_v24  ;;  %347 = vmatpush.bf16.msra.mxu3 %v522_v43 }
  0x22   :  { %183 = vmatmul.bf16.vlgmr.msra.gmra.mxu1 %v62_v25 }
  0x25   :  { %348 = vmatpush.bf16.msra.mxu3 %v521_v44 }
  0x9e   :  { %v171_v35 = vpop.f32.mrf.mxu0 }
  0x9f   :  { %v184_v36 = vpop.f32.mrf.mxu1  ;;  %v172_v37 = vadd.f32 %v529_v34, %v171_v35 }
  0xa1   :  { %v185_v38 = vadd.f32 %v184_v36, %v172_v37 }
  0xa3   :  { %v188_v39 = vmax.f32 %v185_v38, 0.0 }
  0xa5   :  { %v206_v40 = vpack.c.bf16 %v188_v39, %v188_v39 }
  0xa6   :  { %v173_v41 = vpop.f32.mrf.mxu0 }
  0xa7   :  { %v186_v42 = vpop.f32.mrf.mxu1  ;;  %266 = vmatmul.bf16.vlgmr.msra.gmra.mxu2 %v206_v40 }
 0x12a   :  { %v267_v46 = vpop.f32.mrf.mxu2 }
 0x12b   :  { %v268_v47 = vadd.f32 %v530_v45, %v267_v46 }
 0x12d   :  { %v271_v48 = vmax.f32 %v268_v47, 0.0 }
 0x12f   :  { %v289_v49 = vpack.c.bf16 %v271_v48, %v271_v48 }
 0x131   :  { %349 = vmatmul.bf16.vlgmr.msra.gmra.mxu3 %v289_v49 }
 0x132   :  { %v269_v50 = vpop.f32.mrf.mxu2 }
 0x1b4   :  { %v350_v52 = vpop.f32.mrf.mxu3 }
 0x1b5   :  { %v351_v53 = vadd.f32 %v531_v51, %v350_v52 }
 0x1b7   :  { %354 = vmax.xlane.f32.xlu0 %v351_v53 }
 0x1bc   :  { %v352_v54 = vpop.f32.mrf.mxu3 }
 0x22a   :  { %v355_v55 = vpop.xlane.xlu0 %354 }
 0x22b   :  { %v356_v56 = vsub.f32 %v351_v53, %v355_v55 }
 0x22d   :  { %v357_v57 = vmul.f32 1.442695, %v356_v56 }
 0x22f   :  { %532 = vpow2.f32 %v357_v57 }
 0x235   :  { %v533_v58 = vpop.eup %532 }
 0x236   :  { %359 = vadd.xlane.f32.xlu0 %v533_v58 }
 0x2a9   :  { %v360_v59 = vpop.xlane.xlu0 %359 }
 0x2aa   :  { %534 = vlog2.f32 %v360_v59 }
 0x2b0   :  { %v535_v60 = vpop.eup %534 }
 0x2b1   :  { %v362_v61 = vmul.f32 0.6931472, %v535_v60 }
 0x2b3   :  { %v363_v62 = vsub.f32 %v356_v56, %v362_v61 }
 0x2b5   :  { %364 = vst [vmem:[%s697_s7] sm:$0xff] %v363_v62 }

</bundles_post_ra>
